<compile_context>
chip_gen: v5e
topology: v5e:2x2
jax: 0.10.0
libtpu: 0.0.40
codegen_flags: <defaults>
</compile_context>

<pallas_src>
import jax
import jax.numpy as jnp
from jax.experimental import pallas as pl
from jax.experimental.pallas import tpu as pltpu


def _cosine_kernel(temp_ref, shot_ref, pseudo_ref, query_ref, out_ref):
    # temp_ref   : SMEM (1,) f32                (temperature)
    # shot_ref   : VMEM (EB, N, K, D)
    # pseudo_ref : VMEM (EB, N, P, D)
    # query_ref  : VMEM (EB, Q, D)
    # out_ref    : VMEM (EB, Q, N) f32

    # --- class prototypes: sum over each support tensor's shot axis ---------
    # (mean factor dropped: cosine similarity is invariant to prototype scale;
    #  the eps clamp threshold scales by (K+P)^2, negligible.)
    shot_sum = jnp.sum(shot_ref[...].astype(jnp.float32), axis=2)      # (EB,N,D)
    pseudo_sum = jnp.sum(pseudo_ref[...].astype(jnp.float32), axis=2)  # (EB,N,D)
    proto = shot_sum + pseudo_sum                                      # f32, SSA

    q = query_ref[...]                         # (EB,Q,D) input dtype (MXU)
    q_f = q.astype(jnp.float32)

    # --- cosine normalization via rsqrt; clamp matches F.normalize(1e-12) ---
    eps2 = 1e-24                               # = (1e-12)^2 on the squared norm
    inv_p = jax.lax.rsqrt(
        jnp.maximum(jnp.sum(proto * proto, axis=-1, keepdims=True), eps2))
    inv_q = jax.lax.rsqrt(
        jnp.maximum(jnp.sum(q_f * q_f, axis=-1, keepdims=True), eps2))

    proto_n = (proto * inv_p).astype(q.dtype)                          # (EB,N,D)

    # --- logits: temp * <q_hat, p_hat> (batched MXU matmul, no transpose) ---
    raw = jnp.einsum('eqd,end->eqn', q, proto_n,
                     preferred_element_type=jnp.float32)               # (EB,Q,N)
    scale = inv_q * temp_ref[0]                                        # (EB,Q,1)
    out_ref[...] = (raw * scale).astype(out_ref.dtype)


def _round_up(x, m):
    return ((x + m - 1) // m) * m


def _pick_e_blk(E, per_ep_bytes, budget_bytes, dual_tc):
    """Largest episode block that fits the budget; on dual-TC parts keep >=2
    grid steps and (best effort) an even step count."""
    e_blk = max(1, min(E, budget_bytes // max(per_ep_bytes, 1)))
    if dual_tc and E > 1:
        e_blk = min(e_blk, pl.cdiv(E, 2))         # at least 2 steps
        for cand in range(e_blk, 0, -1):          # prefer an even step count
            if pl.cdiv(E, cand) % 2 == 0:
                e_blk = cand
                break
    return int(e_blk)


def cosine_logits(x_shot, x_pseudo, x_query, temp):
    """x_shot: [E,N,K,D], x_pseudo: [E,N,P,D], x_query: [E,Q,D], temp: scalar."""
    E, N, K, D = x_shot.shape
    P = x_pseudo.shape[2]
    Q = x_query.shape[1]

    in_bytes = jnp.dtype(x_shot.dtype).itemsize
    q_bytes = jnp.dtype(x_query.dtype).itemsize
    d_pad = _round_up(D, 128)
    k_pad = _round_up(K, 8)
    p_pad = _round_up(P, 8)
    q_pad = _round_up(Q, 8)
    n_lane = _round_up(N, 128)

    # --- per-episode VMEM bytes: I/O buffers (x2 double-buffer) + a
    #     conservative bound on f32 kernel-live intermediates --------------
    io_per_ep = (N * k_pad * d_pad * in_bytes          # shot block
                 + N * p_pad * d_pad * in_bytes        # pseudo block
                 + q_pad * d_pad * q_bytes             # query block
                 + q_pad * n_lane * 4)                 # output block (f32)
    work_per_ep = (N * (k_pad + p_pad) * d_pad * 4     # f32 casts of support
                   + 2 * _round_up(N, 8) * d_pad * 4   # proto + proto_n
                   + q_pad * d_pad * 4                 # q_f
                   + q_pad * n_lane * 4)               # raw logits
    per_ep = 2 * io_per_ep + work_per_ep

    # --- generation-aware budget (v5e/v6e: 128 MiB VMEM/TC, v7x: 64 MiB) ----
    try:
        vmem_cap = int(pltpu.get_tpu_info().vmem_capacity_bytes)
    except Exception:
        vmem_cap = 64 * 1024 * 1024                    # safe v7x-sized fallback
    dual_tc = vmem_cap <= 64 * 1024 * 1024             # v7x: 2 TCs share the grid
    budget = int(vmem_cap * 0.4)                       # leave compiler headroom

    e_blk = _pick_e_blk(E, per_ep, budget, dual_tc)
    grid = (pl.cdiv(E, e_blk),)

    vmem_limit = int(min(vmem_cap - 8 * 1024 * 1024,
                         max(per_ep * e_blk, budget) + 16 * 1024 * 1024))

    temp_arr = jnp.asarray([temp], dtype=jnp.float32)

    return pl.pallas_call(
        _cosine_kernel,
        out_shape=jax.ShapeDtypeStruct((E, Q, N), jnp.float32),
        grid_spec=pltpu.PrefetchScalarGridSpec(
            num_scalar_prefetch=0,
            grid=grid,
            in_specs=[
                pl.BlockSpec(memory_space=pltpu.SMEM),                    # temp
                pl.BlockSpec((e_blk, N, K, D), lambda e: (e, 0, 0, 0)),   # shot
                pl.BlockSpec((e_blk, N, P, D), lambda e: (e, 0, 0, 0)),   # pseudo
                pl.BlockSpec((e_blk, Q, D), lambda e: (e, 0, 0)),         # query
            ],
            out_specs=pl.BlockSpec((e_blk, Q, N), lambda e: (e, 0, 0)),
        ),
        compiler_params=pltpu.CompilerParams(
            dimension_semantics=("parallel",),
            vmem_limit_bytes=vmem_limit,
        ),
    )(temp_arr, x_shot, x_pseudo, x_query)


def cosine_logits_ref(x_shot, x_pseudo, x_query, temp):
    """Pure-JAX reference for the same math."""
    support = jnp.concatenate([x_shot, x_pseudo], axis=2)        # [E,N,K+P,D]
    proto = jnp.mean(support, axis=2)                            # [E,N,D]
    eps = 1e-12
    pn = proto / jnp.maximum(jnp.linalg.norm(proto, axis=-1, keepdims=True), eps)
    qn = x_query / jnp.maximum(jnp.linalg.norm(x_query, axis=-1, keepdims=True), eps)
    return jnp.einsum("eqd,end->eqn", qn, pn) * temp


if __name__ == "__main__":
    # 4 episodes, 8-way, 1-shot, 2 pseudo-shots, 16 queries, 128-d features.
    E, N, K, P, Q, D = 4, 8, 1, 2, 16, 128
    key = jax.random.PRNGKey(0)
    k1, k2, k3 = jax.random.split(key, 3)

    x_shot = jax.random.normal(k1, (E, N, K, D), dtype=jnp.float32)
    x_pseudo = jax.random.normal(k2, (E, N, P, D), dtype=jnp.float32)
    x_query = jax.random.normal(k3, (E, Q, D), dtype=jnp.float32)

    temp = 10.0   # learnable temperature, deterministically initialized

    logits = cosine_logits(x_shot, x_pseudo, x_query, temp)
    jax.block_until_ready(logits)

    ref = cosine_logits_ref(x_shot, x_pseudo, x_query, temp)
    assert logits.shape == (E, Q, N)
    assert jnp.allclose(logits, ref, atol=1e-3, rtol=1e-3), "mismatch vs reference"

    print("KERNEL_OK")
</pallas_src>

<mosaic_0001>
module attributes {stable_mosaic.version = 11 : i64} {
  func.func @_cosine_kernel(%arg0: i32, %arg1: memref<1xf32, #tpu.memory_space<smem>>, %arg2: memref<2x8x1x128xf32, #tpu.memory_space<vmem>>, %arg3: memref<2x8x2x128xf32, #tpu.memory_space<vmem>>, %arg4: memref<2x16x128xf32, #tpu.memory_space<vmem>>, %arg5: memref<2x16x8xf32, #tpu.memory_space<vmem>>) attributes {dimension_semantics = [#tpu.dimension_semantics<parallel>], iteration_bounds = array<i64: 2>, scalar_prefetch = 0 : i64, scratch_operands = 0 : i64, tpu.core_type = #tpu.core_type<tc>, window_params = [{transform_indices = @transform_0, window_bounds = array<i64: 1>}, {transform_indices = @transform_1, window_bounds = array<i64: 2, 8, 1, 128>}, {transform_indices = @transform_2, window_bounds = array<i64: 2, 8, 2, 128>}, {transform_indices = @transform_3, window_bounds = array<i64: 2, 16, 128>}, {transform_indices = @transform_4, window_bounds = array<i64: 2, 16, 8>}]} {
    %c0 = arith.constant 0 : index
    %c0_0 = arith.constant 0 : index
    %c0_1 = arith.constant 0 : index
    %c0_2 = arith.constant 0 : index
    %0 = vector.load %arg2[%c0, %c0_0, %c0_1, %c0_2] : memref<2x8x1x128xf32, #tpu.memory_space<vmem>>, vector<2x8x1x128xf32>
    %cst = arith.constant dense<0.000000e+00> : vector<2x8x128xf32>
    %1 = vector.multi_reduction <add>, %0, %cst [2] : vector<2x8x1x128xf32> to vector<2x8x128xf32>
    %c0_3 = arith.constant 0 : index
    %c0_4 = arith.constant 0 : index
    %c0_5 = arith.constant 0 : index
    %c0_6 = arith.constant 0 : index
    %2 = vector.load %arg3[%c0_3, %c0_4, %c0_5, %c0_6] : memref<2x8x2x128xf32, #tpu.memory_space<vmem>>, vector<2x8x2x128xf32>
    %cst_7 = arith.constant dense<0.000000e+00> : vector<2x8x128xf32>
    %3 = vector.multi_reduction <add>, %2, %cst_7 [2] : vector<2x8x2x128xf32> to vector<2x8x128xf32>
    %4 = arith.addf %1, %3 : vector<2x8x128xf32>
    %c0_8 = arith.constant 0 : index
    %c0_9 = arith.constant 0 : index
    %c0_10 = arith.constant 0 : index
    %5 = vector.load %arg4[%c0_8, %c0_9, %c0_10] : memref<2x16x128xf32, #tpu.memory_space<vmem>>, vector<2x16x128xf32>
    %6 = arith.mulf %4, %4 : vector<2x8x128xf32>
    %cst_11 = arith.constant dense<0.000000e+00> : vector<2x8xf32>
    %7 = vector.multi_reduction <add>, %6, %cst_11 [2] : vector<2x8x128xf32> to vector<2x8xf32>
    %8 = vector.shape_cast %7 : vector<2x8xf32> to vector<2x8x1xf32>
    %cst_12 = arith.constant 1.000000e-24 : f32
    %9 = vector.broadcast %cst_12 : f32 to vector<2x8x1xf32>
    %10 = arith.maximumf %8, %9 : vector<2x8x1xf32>
    %11 = math.rsqrt %10 : vector<2x8x1xf32>
    %12 = arith.mulf %5, %5 : vector<2x16x128xf32>
    %cst_13 = arith.constant dense<0.000000e+00> : vector<2x16xf32>
    %13 = vector.multi_reduction <add>, %12, %cst_13 [2] : vector<2x16x128xf32> to vector<2x16xf32>
    %14 = vector.shape_cast %13 : vector<2x16xf32> to vector<2x16x1xf32>
    %cst_14 = arith.constant 1.000000e-24 : f32
    %15 = vector.broadcast %cst_14 : f32 to vector<2x16x1xf32>
    %16 = arith.maximumf %14, %15 : vector<2x16x1xf32>
    %17 = math.rsqrt %16 : vector<2x16x1xf32>
    %18 = vector.broadcast %11 : vector<2x8x1xf32> to vector<2x8x128xf32>
    %19 = arith.mulf %4, %18 : vector<2x8x128xf32>
    "tpu.trace_start"() <{level = 10 : i32, message = "eqd,end->eqn"}> : () -> ()
    %cst_15 = arith.constant dense<0.000000e+00> : vector<2x16x8xf32>
    %20 = tpu.matmul %5, %19, %cst_15 {dimension_numbers = #tpu.dot_dimension_numbers<[2], [2], [1], [1], [0, 0, 0, 1, 1, 1], [0], [0]>} : vector<2x16x128xf32>, vector<2x8x128xf32>, vector<2x16x8xf32> -> vector<2x16x8xf32>
    "tpu.trace_stop"() : () -> ()
    %c0_16 = arith.constant 0 : index
    %21 = memref.load %arg1[%c0_16] : memref<1xf32, #tpu.memory_space<smem>>
    %22 = vector.broadcast %21 : f32 to vector<2x16x1xf32>
    %23 = arith.mulf %17, %22 : vector<2x16x1xf32>
    %24 = vector.broadcast %23 : vector<2x16x1xf32> to vector<2x16x8xf32>
    %25 = arith.mulf %20, %24 : vector<2x16x8xf32>
    %c0_17 = arith.constant 0 : index
    %c0_18 = arith.constant 0 : index
    %c0_19 = arith.constant 0 : index
    %26 = vector.load %arg5[%c0_17, %c0_18, %c0_19] : memref<2x16x8xf32, #tpu.memory_space<vmem>>, vector<2x16x8xf32>
    tpu.vector_store %arg5[%c0_17, %c0_18, %c0_19], %25 {strides = array<i32>} : memref<2x16x8xf32, #tpu.memory_space<vmem>>, vector<2x16x8xf32>,
    return
  }
  func.func @transform_0(%arg0: i32) -> i32 {
    %c0_i32 = arith.constant 0 : i32
    %c0_i32_0 = arith.constant 0 : i32
    return %c0_i32 : i32
  }
  func.func @transform_1(%arg0: i32) -> (i32, i32, i32, i32) {
    %c0_i32 = arith.constant 0 : i32
    %c0_i32_0 = arith.constant 0 : i32
    %c0_i32_1 = arith.constant 0 : i32
    %c0_i32_2 = arith.constant 0 : i32
    return %arg0, %c0_i32, %c0_i32_0, %c0_i32_1 : i32, i32, i32, i32
  }
  func.func @transform_2(%arg0: i32) -> (i32, i32, i32, i32) {
    %c0_i32 = arith.constant 0 : i32
    %c0_i32_0 = arith.constant 0 : i32
    %c0_i32_1 = arith.constant 0 : i32
    %c0_i32_2 = arith.constant 0 : i32
    return %arg0, %c0_i32, %c0_i32_0, %c0_i32_1 : i32, i32, i32, i32
  }
  func.func @transform_3(%arg0: i32) -> (i32, i32, i32) {
    %c0_i32 = arith.constant 0 : i32
    %c0_i32_0 = arith.constant 0 : i32
    %c0_i32_1 = arith.constant 0 : i32
    return %arg0, %c0_i32, %c0_i32_0 : i32, i32, i32
  }
  func.func @transform_4(%arg0: i32) -> (i32, i32, i32) {
    %c0_i32 = arith.constant 0 : i32
    %c0_i32_0 = arith.constant 0 : i32
    %c0_i32_1 = arith.constant 0 : i32
    return %arg0, %c0_i32, %c0_i32_0 : i32, i32, i32
  }
}

</mosaic_0001>

<bundles_post_ra>
// kernel: tpu_custom_call.1
= control target key start
LH: loop header
LB: loop body
LE: loop exit
PB: predicated region body
PF: predicated region fallthrough
CT: control target
= control target key end

     0   :  { %s1481_s0 = inlined_call_operand.<no memory space> [shape: f32[1], index: 0, kind: input, shape index: {}]   ;;  %s1482_s1 = inlined_call_operand.hbm [shape: f32[4,8,1,128], index: 1, kind: input, shape index: {}]   ;;  %s1483_s2 = inlined_call_operand.hbm [shape: f32[4,8,2,128], index: 2, kind: input, shape index: {}]   ;;  %s1484_s3 = inlined_call_operand.hbm [shape: f32[4,16,128], index: 3, kind: input, shape index: {}]   ;;  %s1485_s4 = inlined_call_operand.vmem [shape: f32[4,16,8], index: 4, kind: output, shape index: {}]  }
   0x1   :  { %9 = sst [smem:[#allocation2]] %s1481_s0 }
   0x2   :  { %10 = vsyncpa [#allocation4], 0 }
   0x3   :  { %12 = vsyncpa [#allocation4 + $0x1], 0 }
   0x4   :  { %13 = vsyncpa [#allocation6], 0 }
   0x5   :  { %15 = vsyncpa [#allocation6 + $0x1], 0  ;;  %s1168_s17 = smov 0   ;;  %s1170_s18 = smov 0  }
   0x6   :  { %s1172_s19 = smov 0   ;;  %s1174_s20 = smov 0  }
   0x7 LB: > { %s1187_s0 = sadd.s32 4294967295, %s1132_s20   ;;  %s1190_s21 = sadd.s32 1, %s1132_s20   ;;  %s1132_s20 = sphi %s1174_s20, %s1492_s20   ;;  %s1128_s19 = sphi %s1172_s19, %s1491_s19   ;;  %s1124_s18 = sphi %s1170_s18, %s1490_s18   ;;  %s1120_s17 = sphi %s1168_s17, %s1489_s17  }
   0x8   : > { %s46_s22 = ssub.s32 %s1132_s20, %s1190_s21  ;;  %s49_s23 = sadd.s32 1, %s1128_s19 }
   0x9   : > { %p47_p0 = scmp.eq.s32.totalorder %s46_s22, 0  ;;  %p56_p1 = scmp.ne.s32.totalorder %s1128_s19, %s1124_s18 }
   0xa   : > { %p57_p2 = scmp.eq.s32.totalorder %s1132_s20, 0  ;;  %p62_p3 = scmp.ne.s32.totalorder %s1124_s18, %s1120_s17 }
   0xb   : > { %s1200_s24 = scalar_select %p47_p0, %s1128_s19, %s49_s23  }
   0xc   : > { %p58_p4 = por %p57_p2, %p56_p1  ;;  %p63_p5 = scmp.eq.s32.totalorder %s1187_s0, 0 }
   0xd   : > { %p953_p6 = scmp.lt.s32.totalorder %s1132_s20, 2  ;;  %s1209_s26 = sand.u32 1, %s1128_s19  }
   0xe   : > { %p1204_p7 = por %p63_p5, %p62_p3  ;;  %s189_s28 = sand.u32 1, %s1132_s20  }
   0xf   : > { %p1211_p8 = pnand %p953_p6, %p58_p4  ;;  %s912_s29 = sshll.u32 %s1209_s26, 5 }
  0x10   : > { %s931_s30 = sshll.u32 %s1132_s20, 5  ;;  %s193_s5 = scalar_lea.vmem [#allocation5], %s912_s29 }
  0x11   : > { %s202_s6 = sshll.u32 %s193_s5, 4  ;;  %s199_s9 = scalar_lea.hbm %s1483_s2, %s931_s30  ;;  %s203_s6 = int_to_ptr.vmem [resolvable:$true] %s202_s6 }
  0x12   : > { %s200_s10 = sshll.u32 %s199_s9, 4  ;;  %s1223_s11 = scalar_lea.sflag [#allocation6], %s189_s28  ;;  %s201_s10 = int_to_ptr.hbm [resolvable:$true] %s200_s10 }
  0x13   : > { %s1004_s12 = sshra.s32 %s201_s10, 4  ;;  %p1008_p10 = pneg %p1211_p8  ;;  %s1005_s12 = int_to_ptr.hbm [resolvable:$true] %s1004_s12 }
  0x14   : > { %s1006_s13 = scalar_lea.hbm %s1005_s12, 32  ;;  %s1011_s16 = scalar_lea.hbm %s1483_s2, 64 }
  0x15   : > { %p1007_p9 = scmp.ne.s32.totalorder %s1005_s12, %s1006_s13  ;;  %p1012_p13 = scmp.lt.s32.totalorder %s1005_s12, %s1483_s2 }
  0x16   : > { %p1013_p0 = scmp.lt.s32.totalorder %s1011_s16, %s1006_s13 }
  0x17   : > { %p1009_p11 = pnand %p1008_p10, %p1007_p9 }
  0x18   : > { %p1014_p1 = por %p1013_p0, %p1012_p13 }
  0x19   : > { %p1010_p12 = pneg %p1009_p11 }
  0x1b   : > { %p1015_p2 = pnand %p1014_p1, %p1010_p12 }
  0x1d   : > { %1018 = shalt.err (!%p1015_p2)
}
  0x1e   : > { %s1134_s23 = smov 32   ;;  %s1135_s28 = smov 2  }
  0x1f   : > { %949 = dma.hbm_to_vmem [thread:$0]  (!%p1211_p8), %s201_s10, 512, %s203_s6, %s1223_s11, %s1134_s23, %s1134_s23, %s1135_s28  }
  0x20   : > { %s222_s8 = scalar_lea.hbm %s1484_s3, %s931_s30  ;;  %s216_s12 = scalar_lea.vmem [#allocation7], %s912_s29 }
  0x21   : > { %s223_s9 = sshll.u32 %s222_s8, 4  ;;  %s225_s13 = sshll.u32 %s216_s12, 4  ;;  %s1244_s9 = int_to_ptr.hbm [resolvable:$true] %s223_s9  ;;  %s1246_s13 = int_to_ptr.vmem [resolvable:$true] %s225_s13 }
  0x22   : > { %p920_p3 = scmp.ge.s32.totalorder %s1132_s20, 1  ;;  %p233_p4 = scmp.lt.s32.totalorder %s1132_s20, 3 }
  0x23   : > { %s909_s14 = sshll.u32 %s1209_s26, 4  ;;  %s929_s6 = sshll.u32 %s1132_s20, 4 }
  0x24   : > { %p1251_p5 = pnand %p920_p3, %p233_p4  ;;  %s171_s10 = scalar_lea.vmem [#allocation3], %s909_s14 }
  0x25   : > { %s179_s30 = sshll.u32 %s171_s10, 4  ;;  %s176_s29 = scalar_lea.hbm %s1482_s1, %s929_s6  ;;  %s180_s30 = int_to_ptr.vmem [resolvable:$true] %s179_s30 }
  0x26   : > { %s177_s22 = sshll.u32 %s176_s29, 4  ;;  %s168_s23 = scalar_lea.sflag [#allocation4], %s1209_s26  ;;  %s178_s22 = int_to_ptr.hbm [resolvable:$true] %s177_s22 }
  0x27   : > { %s1034_s28 = sshra.s32 %s178_s22, 4  ;;  %s1041_s8 = scalar_lea.hbm %s1482_s1, 32  ;;  %s1035_s28 = int_to_ptr.hbm [resolvable:$true] %s1034_s28 }
  0x28   : > { %s1036_s5 = scalar_lea.hbm %s1035_s28, 16  ;;  %p1042_p12 = scmp.lt.s32.totalorder %s1035_s28, %s1482_s1 }
  0x29   : > { %p1037_p6 = scmp.ne.s32.totalorder %s1035_s28, %s1036_s5  ;;  %p1043_p13 = scmp.lt.s32.totalorder %s1041_s8, %s1036_s5 }
  0x2b   : > { %p1039_p9 = pnand %p1037_p6, %p1008_p10  ;;  %p1044_p0 = por %p1043_p13, %p1042_p12 }
  0x2d   : > { %p1040_p11 = pneg %p1039_p9 }
  0x2f   : > { %p1045_p1 = pnand %p1044_p0, %p1040_p11 }
  0x31   : > { %1048 = shalt.err (!%p1045_p1)
}
  0x32   : > { %s1136_s26 = smov 16   ;;  %s1137_s6 = smov 1  }
  0x33   : > { %946 = dma.hbm_to_vmem [thread:$0]  (!%p1211_p8), %s178_s22, 256, %s180_s30, %s168_s23, %s1136_s26, %s1136_s26, %s1137_s6  }
  0x34   : > { %s1064_s10 = sshra.s32 %s1244_s9, 4  ;;  %s1071_s28 = scalar_lea.hbm %s1484_s3, 64  ;;  %s1065_s10 = int_to_ptr.hbm [resolvable:$true] %s1064_s10 }
  0x35   : > { %s1066_s16 = scalar_lea.hbm %s1065_s10, 32  ;;  %p1072_p6 = scmp.lt.s32.totalorder %s1065_s10, %s1484_s3 }
  0x36   : > { %p1067_p2 = scmp.ne.s32.totalorder %s1065_s10, %s1066_s16  ;;  %p1073_p9 = scmp.lt.s32.totalorder %s1071_s28, %s1066_s16 }
  0x38   : > { %p1069_p3 = pnand %p1067_p2, %p1008_p10  ;;  %p1074_p11 = por %p1073_p9, %p1072_p6 }
  0x3a   : > { %p1070_p4 = pneg %p1069_p3 }
  0x3c   : > { %p1075_p12 = pnand %p1074_p11, %p1070_p4 }
  0x3e   : > { %1078 = shalt.err (!%p1075_p12)
}
  0x3f   : > { %s1138_s30 = smov 128   ;;  %s1139_s22 = smov 8  }
  0x40   : > { %952 = dma.hbm_to_vmem [thread:$0]  (!%p1211_p8), %s1244_s9, 512, %s1246_s13, %s1223_s11, %s1138_s30, %s1138_s30, %s1139_s22  }
  0x41   : > { %237 = sbr.rel (%p1251_p5) target bundleno = 423 (0x1a7), region = 36  ;;  %s1289_s23 = sand.u32 (!%p1251_p5), 1, %s1124_s18  }
  0x42   : > { %s921_s20 = sshll.u32 (!%p1251_p5), %s1289_s23, 4  ;;  %s240_s8 = scalar_lea.sflag (!%p1251_p5), [#allocation4], %s1289_s23 }
  0x43   : > { %s1293_s12 = scalar_lea.vmem (!%p1251_p5), [#allocation3], %s921_s20 }
  0x46   : > { %1111 = dma.done.wait (%p1204_p7), %s240_s8, 256  }
  0x47   : > { %1113 = vsyncadd (%p1204_p7), %s240_s8, 4294967040  ;;  %s249_s27 = sand.u32 1, %s1187_s0   ;;  %s922_s11 = sshll.u32 %s1289_s23, 5 }
  0x48   : > { %s250_s9 = scalar_lea.sflag [#allocation6], %s249_s27  ;;  %s1303_s13 = scalar_lea.vmem [#allocation5], %s922_s11 }
  0x49   : > { %1115 = dma.done.wait (%p1204_p7), %s250_s9, 1024  }
  0x4a   : > { %1117 = vsyncadd (%p1204_p7), %s250_s9, 4294966272  ;;  %v342_v0 = vld [vmem:[%s1303_s13] sm:$0x3]  ;;  %vm358_vm0 = vcmask 1041408   ;;  %v343_v1 = vld [vmem:[%s1303_s13 + $0x2] sm:$0x3] }
  0x4b   : > { %v344_v2 = vld [vmem:[%s1303_s13 + $0x4] sm:$0x3]  ;;  %v345_v3 = vld [vmem:[%s1303_s13 + $0x6] sm:$0x3]  ;;  %v346_v4 = vld [vmem:[%s1303_s13 + $0x8] sm:$0x3] }
  0x4c   : > { %v347_v5 = vld [vmem:[%s1303_s13 + $0xa] sm:$0x3]  ;;  %v348_v6 = vld [vmem:[%s1303_s13 + $0xc] sm:$0x3]  ;;  %v349_v7 = vld [vmem:[%s1303_s13 + $0xe] sm:$0x3] }
  0x4d   : > { %v359_v8 = vsel %vm358_vm0, %v342_v0, 0.0  ;;  %v366_v9 = vsel %vm358_vm0, %v343_v1, 0.0  ;;  %v373_v10 = vsel %vm358_vm0, %v344_v2, 0.0  ;;  %v380_v11 = vsel %vm358_vm0, %v345_v3, 0.0  ;;  %v310_v44 = vld [vmem:[%s1293_s12] sm:$0x1] }
  0x4e   : > { %v360_v12 = vrot.slane %v359_v8, 4  ;;  %v367_v13 = vrot.slane %v366_v9, 4  ;;  %v374_v14 = vrot.slane %v373_v10, 4  ;;  %v381_v15 = vrot.slane %v380_v11, 4  ;;  %v311_v49 = vld [vmem:[%s1293_s12 + $0x1] sm:$0x1] }
  0x4f   : > { %v387_v16 = vsel %vm358_vm0, %v346_v4, 0.0  ;;  %v394_v17 = vsel %vm358_vm0, %v347_v5, 0.0  ;;  %v401_v18 = vsel %vm358_vm0, %v348_v6, 0.0  ;;  %v408_v19 = vsel %vm358_vm0, %v349_v7, 0.0  ;;  %v312_v50 = vld [vmem:[%s1293_s12 + $0x2] sm:$0x1] }
  0x50   : > { %v361_v20 = vadd.f32 %v360_v12, %v359_v8  ;;  %v368_v21 = vadd.f32 %v367_v13, %v366_v9  ;;  %v375_v22 = vadd.f32 %v374_v14, %v373_v10  ;;  %v382_v23 = vadd.f32 %v381_v15, %v380_v11  ;;  %v313_v51 = vld [vmem:[%s1293_s12 + $0x3] sm:$0x1]  ;;  %v314_v56 = vld [vmem:[%s1293_s12 + $0x4] sm:$0x1]  ;;  %v315_v61 = vld [vmem:[%s1293_s12 + $0x5] sm:$0x1] }
  0x51   : > { %v388_v24 = vrot.slane %v387_v16, 4  ;;  %v395_v25 = vrot.slane %v394_v17, 4  ;;  %v402_v26 = vrot.slane %v401_v18, 4  ;;  %v409_v27 = vrot.slane %v408_v19, 4  ;;  %v316_v2 = vld [vmem:[%s1293_s12 + $0x6] sm:$0x1] }
  0x52   : > { %v362_v28 = vrot.slane %v361_v20, 2  ;;  %v369_v29 = vrot.slane %v368_v21, 2  ;;  %v376_v30 = vrot.slane %v375_v22, 2  ;;  %v383_v31 = vrot.slane %v382_v23, 2  ;;  %v317_v3 = vld [vmem:[%s1293_s12 + $0x7] sm:$0x1] }
  0x53   : > { %v389_v32 = vadd.f32 %v388_v24, %v387_v16  ;;  %v396_v33 = vadd.f32 %v395_v25, %v394_v17  ;;  %v403_v34 = vadd.f32 %v402_v26, %v401_v18  ;;  %v410_v35 = vadd.f32 %v409_v27, %v408_v19  ;;  %v350_v8 = vld [vmem:[%s1303_s13 + $0x10] sm:$0x3]  ;;  %v351_v13 = vld [vmem:[%s1303_s13 + $0x12] sm:$0x3]  ;;  %v352_v14 = vld [vmem:[%s1303_s13 + $0x14] sm:$0x3] }
  0x54   : > { %v363_v36 = vadd.f32 %v362_v28, %v361_v20  ;;  %v370_v37 = vadd.f32 %v369_v29, %v368_v21  ;;  %v377_v38 = vadd.f32 %v376_v30, %v375_v22  ;;  %v384_v39 = vadd.f32 %v383_v31, %v382_v23  ;;  %v353_v15 = vld [vmem:[%s1303_s13 + $0x16] sm:$0x3]  ;;  %v354_v20 = vld [vmem:[%s1303_s13 + $0x18] sm:$0x3]  ;;  %v355_v25 = vld [vmem:[%s1303_s13 + $0x1a] sm:$0x3] }
  0x55   : > { %v390_v40 = vrot.slane %v389_v32, 2  ;;  %v397_v41 = vrot.slane %v396_v33, 2  ;;  %v404_v42 = vrot.slane %v403_v34, 2  ;;  %v411_v43 = vrot.slane %v410_v35, 2  ;;  %v356_v26 = vld [vmem:[%s1303_s13 + $0x1c] sm:$0x3] }
  0x56   : > { %v364_v45 = vrot.slane %v363_v36, 1  ;;  %v371_v46 = vrot.slane %v370_v37, 1  ;;  %v378_v47 = vrot.slane %v377_v38, 1  ;;  %v385_v48 = vrot.slane %v384_v39, 1  ;;  %v357_v27 = vld [vmem:[%s1303_s13 + $0x1e] sm:$0x3] }
  0x57   : > { %v391_v52 = vadd.f32 %v390_v40, %v389_v32  ;;  %v398_v53 = vadd.f32 %v397_v41, %v396_v33  ;;  %v405_v54 = vadd.f32 %v404_v42, %v403_v34  ;;  %v412_v55 = vadd.f32 %v411_v43, %v410_v35  ;;  %s263_s25 = scalar_lea.vmem [#allocation7], %s922_s11  ;;  %s924_s15 = sshll.u32 %s1187_s0, 1 }
  0x58   : > { %v365_v57 = vadd.f32 %v364_v45, %v363_v36  ;;  %v372_v58 = vadd.f32 %v371_v46, %v370_v37  ;;  %v379_v59 = vadd.f32 %v378_v47, %v377_v38  ;;  %v386_v60 = vadd.f32 %v385_v48, %v384_v39  ;;  %s778_s14 = sld [smem:[#allocation2]]  ;;  %p304_p7 = scmp.lt.s32.totalorder %s924_s15, 3 }
  0x59   : > { %v392_v62 = vrot.slane %v391_v52, 1  ;;  %v399_v63 = vrot.slane %v398_v53, 1  ;;  %v406_v0 = vrot.slane %v405_v54, 1  ;;  %v413_v1 = vrot.slane %v412_v55, 1 }
  0x5a   : > { %v1333_v4 = vadd.f32 %v365_v57, %v310_v44  ;;  %v1335_v5 = vadd.f32 %v372_v58, %v311_v49  ;;  %v1337_v6 = vadd.f32 %v379_v59, %v312_v50  ;;  %v1339_v7 = vadd.f32 %v386_v60, %v313_v51  ;;  %s1494_s15 = smov (!%p304_p7, %s924_s15), 3 }
  0x5b   : > { %v393_v9 = vadd.f32 %v392_v62, %v391_v52  ;;  %v400_v10 = vadd.f32 %v399_v63, %v398_v53  ;;  %v407_v11 = vadd.f32 %v406_v0, %v405_v54  ;;  %v414_v12 = vadd.f32 %v413_v1, %v412_v55  ;;  %s934_s0 = sshll.u32 %s1494_s15, 4 }
  0x5c   : > { %v491_v16 = vmul.f32 %v1333_v4, %v1333_v4  ;;  %v492_v17 = vmul.f32 %v1335_v5, %v1335_v5  ;;  %v493_v18 = vmul.f32 %v1337_v6, %v1337_v6  ;;  %v494_v19 = vmul.f32 %v1339_v7, %v1339_v7  ;;  %s1458_s10 = scalar_lea.vmem %s1485_s4, %s934_s0 }
  0x5d   : > { %v1354_v21 = vadd.f32 %v393_v9, %v314_v56  ;;  %v1356_v22 = vadd.f32 %v400_v10, %v315_v61  ;;  %v1358_v23 = vadd.f32 %v407_v11, %v316_v2  ;;  %v1360_v24 = vadd.f32 %v414_v12, %v317_v3 }
  0x5e   : > { %523 = vst [vmem:[#allocation1] ss:$9 sm:$0xff] %v491_v16  ;;  %v415_v28 = vsel %vm358_vm0, %v350_v8, 0.0  ;;  %v422_v29 = vsel %vm358_vm0, %v351_v13, 0.0  ;;  %v429_v30 = vsel %vm358_vm0, %v352_v14, 0.0  ;;  %v436_v31 = vsel %vm358_vm0, %v353_v15, 0.0 }
  0x5f   : > { %v495_v32 = vmul.f32 %v1354_v21, %v1354_v21  ;;  %v496_v33 = vmul.f32 %v1356_v22, %v1356_v22  ;;  %v497_v34 = vmul.f32 %v1358_v23, %v1358_v23  ;;  %v498_v35 = vmul.f32 %v1360_v24, %v1360_v24  ;;  %525 = vst [vmem:[#allocation1 + $0x1] ss:$9 sm:$0xff] %v492_v17  ;;  %v318_v8 = vld [vmem:[%s1293_s12 + $0x8] sm:$0x1]  ;;  %v319_v13 = vld [vmem:[%s1293_s12 + $0x9] sm:$0x1] }
  0x60   : > { %527 = vst [vmem:[#allocation1 + $0x2] ss:$9 sm:$0xff] %v493_v18  ;;  %v416_v36 = vrot.slane %v415_v28, 4  ;;  %v423_v37 = vrot.slane %v422_v29, 4  ;;  %v430_v38 = vrot.slane %v429_v30, 4  ;;  %v437_v39 = vrot.slane %v436_v31, 4 }
  0x61   : > { %529 = vst [vmem:[#allocation1 + $0x3] ss:$9 sm:$0xff] %v494_v19  ;;  %v443_v40 = vsel %vm358_vm0, %v354_v20, 0.0  ;;  %v450_v41 = vsel %vm358_vm0, %v355_v25, 0.0  ;;  %v457_v42 = vsel %vm358_vm0, %v356_v26, 0.0  ;;  %v464_v43 = vsel %vm358_vm0, %v357_v27, 0.0 }
  0x62   : > { %531 = vst [vmem:[#allocation1 + $0x4] ss:$9 sm:$0xff] %v495_v32  ;;  %v417_v44 = vadd.f32 %v416_v36, %v415_v28  ;;  %v424_v45 = vadd.f32 %v423_v37, %v422_v29  ;;  %v431_v46 = vadd.f32 %v430_v38, %v429_v30  ;;  %v438_v47 = vadd.f32 %v437_v39, %v436_v31  ;;  %v320_v14 = vld [vmem:[%s1293_s12 + $0xa] sm:$0x1]  ;;  %v321_v15 = vld [vmem:[%s1293_s12 + $0xb] sm:$0x1] }
  0x63   : > { %533 = vst [vmem:[#allocation1 + $0x5] ss:$9 sm:$0xff] %v496_v33  ;;  %v444_v48 = vrot.slane %v443_v40, 4  ;;  %v451_v49 = vrot.slane %v450_v41, 4  ;;  %v458_v50 = vrot.slane %v457_v42, 4  ;;  %v465_v51 = vrot.slane %v464_v43, 4 }
  0x64   : > { %535 = vst [vmem:[#allocation1 + $0x6] ss:$9 sm:$0xff] %v497_v34  ;;  %v418_v52 = vrot.slane %v417_v44, 2  ;;  %v425_v53 = vrot.slane %v424_v45, 2  ;;  %v432_v54 = vrot.slane %v431_v46, 2  ;;  %v439_v55 = vrot.slane %v438_v47, 2 }
  0x65   : > { %537 = vst [vmem:[#allocation1 + $0x7] ss:$9 sm:$0xff] %v498_v35  ;;  %v445_v56 = vadd.f32 %v444_v48, %v443_v40  ;;  %v452_v57 = vadd.f32 %v451_v49, %v450_v41  ;;  %v459_v58 = vadd.f32 %v458_v50, %v457_v42  ;;  %v466_v59 = vadd.f32 %v465_v51, %v464_v43  ;;  %v322_v20 = vld [vmem:[%s1293_s12 + $0xc] sm:$0x1]  ;;  %v323_v29 = vld [vmem:[%s1293_s12 + $0xd] sm:$0x1] }
  0x66   : > { %v419_v60 = vadd.f32 %v418_v52, %v417_v44  ;;  %v426_v61 = vadd.f32 %v425_v53, %v424_v45  ;;  %v433_v62 = vadd.f32 %v432_v54, %v431_v46  ;;  %v440_v63 = vadd.f32 %v439_v55, %v438_v47  ;;  %v324_v35 = vld [vmem:[%s1293_s12 + $0xe] sm:$0x1]  ;;  %v325_v36 = vld [vmem:[%s1293_s12 + $0xf] sm:$0x1] }
  0x67   : > { %v446_v0 = vrot.slane %v445_v56, 2  ;;  %v453_v1 = vrot.slane %v452_v57, 2  ;;  %v460_v2 = vrot.slane %v459_v58, 2  ;;  %v467_v3 = vrot.slane %v466_v59, 2 }
  0x68   : > { %v420_v9 = vrot.slane %v419_v60, 1  ;;  %v427_v10 = vrot.slane %v426_v61, 1  ;;  %v434_v11 = vrot.slane %v433_v62, 1  ;;  %v441_v12 = vrot.slane %v440_v63, 1 }
  0x69   : > { %v447_v16 = vadd.f32 %v446_v0, %v445_v56  ;;  %v454_v17 = vadd.f32 %v453_v1, %v452_v57  ;;  %v461_v18 = vadd.f32 %v460_v2, %v459_v58  ;;  %v468_v19 = vadd.f32 %v467_v3, %v466_v59  ;;  %v1423_v58 = vld [vmem:[%s263_s25] sm:$0xff]  ;;  %v488_v0 = vld [vmem:[%s263_s25 + $0x8] sm:$0xff]  ;;  %v1431_v2 = vld [vmem:[%s263_s25 + $0x18] sm:$0xff] }
  0x6a   : > { %v421_v25 = vadd.f32 %v420_v9, %v419_v60  ;;  %v428_v26 = vadd.f32 %v427_v10, %v426_v61  ;;  %v435_v27 = vadd.f32 %v434_v11, %v433_v62  ;;  %v442_v28 = vadd.f32 %v441_v12, %v440_v63  ;;  %v1427_v60 = vld [vmem:[%s263_s25 + $0x10] sm:$0xff] }
  0x6b   : > { %v448_v30 = vrot.slane %v447_v16, 1  ;;  %v455_v31 = vrot.slane %v454_v17, 1  ;;  %v462_v32 = vrot.slane %v461_v18, 1  ;;  %v469_v33 = vrot.slane %v468_v19, 1 }
  0x6c   : > { %v538_v34 = vld [vmem:[#allocation1] sm:$0xff]  ;;  %v1389_v37 = vadd.f32 %v421_v25, %v318_v8  ;;  %v1391_v38 = vadd.f32 %v428_v26, %v319_v13  ;;  %v1393_v39 = vadd.f32 %v435_v27, %v320_v14  ;;  %v1395_v40 = vadd.f32 %v442_v28, %v321_v15 }
  0x6d   : > { %550 = vadd.xlane.f32.xlu0 %v538_v34  ;;  %v449_v41 = vadd.f32 %v448_v30, %v447_v16  ;;  %v456_v42 = vadd.f32 %v455_v31, %v454_v17  ;;  %v463_v43 = vadd.f32 %v462_v32, %v461_v18  ;;  %v470_v44 = vadd.f32 %v469_v33, %v468_v19 }
  0x6e   : > { %v499_v45 = vmul.f32 %v1389_v37, %v1389_v37  ;;  %v500_v46 = vmul.f32 %v1391_v38, %v1391_v38  ;;  %v501_v47 = vmul.f32 %v1393_v39, %v1393_v39  ;;  %v502_v48 = vmul.f32 %v1395_v40, %v1395_v40 }
  0x6f   : > { %v1405_v49 = vadd.f32 %v449_v41, %v322_v20  ;;  %v1407_v50 = vadd.f32 %v456_v42, %v323_v29  ;;  %v1409_v51 = vadd.f32 %v463_v43, %v324_v35  ;;  %v1411_v52 = vadd.f32 %v470_v44, %v325_v36 }
  0x70   : > { %539 = vst [vmem:[#allocation1] ss:$9 sm:$0xff] %v499_v45  ;;  %v576_v59 = vmul.f32 %v1423_v58, %v1423_v58  ;;  %v578_v61 = vmul.f32 %v1427_v60, %v1427_v60  ;;  %v577_v1 = vmul.f32 %v488_v0, %v488_v0  ;;  %v579_v3 = vmul.f32 %v1431_v2, %v1431_v2 }
  0x71   : > { %v503_v53 = vmul.f32 %v1405_v49, %v1405_v49  ;;  %v504_v54 = vmul.f32 %v1407_v50, %v1407_v50  ;;  %540 = vst [vmem:[#allocation1 + $0x1] ss:$9 sm:$0xff] %v500_v46  ;;  %v505_v55 = vmul.f32 %v1409_v51, %v1409_v51  ;;  %v506_v56 = vmul.f32 %v1411_v52, %v1411_v52 }
  0x72   : > { %541 = vst [vmem:[#allocation1 + $0x2] ss:$9 sm:$0xff] %v501_v47  ;;  %580 = vadd.xlane.f32.xlu1 %v576_v59  ;;  %584 = vadd.xlane.f32.xlu2 %v578_v61  ;;  %vm788_vm13 = vcmask 64512  }
  0x73   : > { %542 = vst [vmem:[#allocation1 + $0x3] ss:$9 sm:$0xff] %v502_v48 }
  0x74   : > { %543 = vst [vmem:[#allocation1 + $0x4] ss:$9 sm:$0xff] %v503_v53 }
  0x75   : > { %544 = vst [vmem:[#allocation1 + $0x5] ss:$9 sm:$0xff] %v504_v54 }
  0x76   : > { %545 = vst [vmem:[#allocation1 + $0x6] ss:$9 sm:$0xff] %v505_v55 }
  0x77   : > { %546 = vst [vmem:[#allocation1 + $0x7] ss:$9 sm:$0xff] %v506_v56 }
  0x7a   : > { %582 = vadd.xlane.f32.xlu1 %v577_v1  ;;  %586 = vadd.xlane.f32.xlu2 %v579_v3 }
  0x7e   : > { %v547_v57 = vld [vmem:[#allocation1] sm:$0xff] }
  0x7f   : > { %552 = vadd.xlane.f32.xlu0 %v547_v57 }
  0xe0   : > { %v551_v62 = vpop.xlane.xlu0 %550 }
  0xe1   : > { %v554_v63 = vmax.f32 %v551_v62, 1e-24 }
  0xe3   : > { %992 = vrsqrt.f32 %v554_v63  ;;  %vm562_vm2 = vweird.f32 %v554_v63 }
  0xe9   : > { %v993_v8 = vpop.eup %992 }
  0xea   : > { %v557_v9 = vmul.f32 %v993_v8, %v554_v63  ;;  %vm563_vm1 = vweird.f32 %v993_v8 }
  0xeb   : > { %vm564_vm3 = vmor %vm562_vm2, %vm563_vm1 }
  0xec   : > { %v558_v10 = vmul.f32 %v993_v8, %v557_v9 }
  0xee   : > { %v559_v11 = vmul.f32 0.5, %v558_v10 }
  0xf0   : > { %v560_v12 = vsub.f32 1.5, %v559_v11 }
  0xf2   : > { %v561_v13 = vmul.f32 %v993_v8, %v560_v12  ;;  %v553_v14 = vpop.xlane.xlu0 %552 }
  0xf3   : > { %v555_v16 = vmax.f32 %v553_v14, 1e-24 }
  0xf4   : > { %v565_v15 = vsel %vm564_vm3, %v993_v8, %v561_v13 }
  0xf5   : > { %v634_v17 = vperm.slane %v565_v15, 0  ;;  %v635_v18 = vperm.slane %v565_v15, 1  ;;  %v636_v19 = vperm.slane %v565_v15, 2  ;;  %v637_v20 = vperm.slane %v565_v15, 3 }
  0xf6   : > { %v638_v25 = vperm.slane %v565_v15, 4  ;;  %v639_v26 = vperm.slane %v565_v15, 5  ;;  %v640_v27 = vperm.slane %v565_v15, 6  ;;  %v641_v31 = vperm.slane %v565_v15, 7 }
  0xf7   : > { %v666_v28 = vmul.f32 %v634_v17, %v1333_v4  ;;  %v667_v29 = vmul.f32 %v635_v18, %v1335_v5  ;;  %v668_v30 = vmul.f32 %v636_v19, %v1337_v6  ;;  %v669_v32 = vmul.f32 %v637_v20, %v1339_v7 }
  0xf8   : > { %v670_v33 = vmul.f32 %v638_v25, %v1354_v21  ;;  %994 = vrsqrt.f32 %v555_v16  ;;  %v671_v34 = vmul.f32 %v639_v26, %v1356_v22  ;;  %v672_v35 = vmul.f32 %v640_v27, %v1358_v23 }
  0xf9   : > { %690 = vst [vmem:[#allocation1] ss:$9 sm:$0xff] %v666_v28  ;;  %v673_v36 = vmul.f32 %v641_v31, %v1360_v24  ;;  %vm572_vm5 = vweird.f32 %v555_v16  ;;  %v779_v15 = vstv %s778_s14 }
  0xfa   : > { %692 = vst [vmem:[#allocation1 + $0x1] ss:$9 sm:$0xff] %v667_v29 }
  0xfb   : > { %694 = vst [vmem:[#allocation1 + $0x2] ss:$9 sm:$0xff] %v668_v30 }
  0xfc   : > { %696 = vst [vmem:[#allocation1 + $0x3] ss:$9 sm:$0xff] %v669_v32 }
  0xfd   : > { %698 = vst [vmem:[#allocation1 + $0x4] ss:$9 sm:$0xff] %v670_v33 }
  0xfe   : > { %700 = vst [vmem:[#allocation1 + $0x5] ss:$9 sm:$0xff] %v671_v34  ;;  %v995_v4 = vpop.eup %994 }
  0xff   : > { %702 = vst [vmem:[#allocation1 + $0x6] ss:$9 sm:$0xff] %v672_v35  ;;  %v567_v5 = vmul.f32 %v995_v4, %v555_v16  ;;  %vm573_vm4 = vweird.f32 %v995_v4 }
 0x100   : > { %704 = vst [vmem:[#allocation1 + $0x7] ss:$9 sm:$0xff] %v673_v36  ;;  %vm574_vm6 = vmor %vm572_vm5, %vm573_vm4 }
 0x101   : > { %v568_v6 = vmul.f32 %v995_v4, %v567_v5 }
 0x103   : > { %v569_v7 = vmul.f32 0.5, %v568_v6 }
 0x105   : > { %v570_v21 = vsub.f32 1.5, %v569_v7 }
 0x107   : > { %v705_v41 = vld [vmem:[#allocation1] sm:$0xff]  ;;  %v571_v42 = vmul.f32 %v995_v4, %v570_v21 }
 0x108   : > { %722 = vmatpush.xpose.msra.mxu0 %v705_v41  ;;  %935 = vmatpush.xpose.msra.mxu2 %v705_v41 }
 0x109   : > { %v575_v22 = vsel %vm574_vm6, %v995_v4, %v571_v42 }
 0x10a   : > { %v642_v23 = vperm.slane %v575_v22, 0  ;;  %v643_v24 = vperm.slane %v575_v22, 1  ;;  %v644_v43 = vperm.slane %v575_v22, 2  ;;  %v645_v44 = vperm.slane %v575_v22, 3 }
 0x10b   : > { %723 = vmatmul.f32.vlgmr.msra.gmra.mxu0 %v1423_v58  ;;  %726 = vmatmul.f32.vlgmr.msra.gmra.mxu2 %v488_v0  ;;  %v646_v45 = vperm.slane %v575_v22, 4  ;;  %v647_v46 = vperm.slane %v575_v22, 5  ;;  %v648_v47 = vperm.slane %v575_v22, 6  ;;  %v649_v55 = vperm.slane %v575_v22, 7 }
 0x10c   : > { %v674_v48 = vmul.f32 %v642_v23, %v1389_v37  ;;  %v675_v53 = vmul.f32 %v643_v24, %v1391_v38  ;;  %v676_v54 = vmul.f32 %v644_v43, %v1393_v39  ;;  %v677_v56 = vmul.f32 %v645_v44, %v1395_v40  ;;  %v581_v38 = vpop.xlane.xlu1 %580 }
 0x10d   : > { %v678_v57 = vmul.f32 %v646_v45, %v1405_v49  ;;  %v679_v59 = vmul.f32 %v647_v46, %v1407_v50  ;;  %v680_v58 = vmul.f32 %v648_v47, %v1409_v51  ;;  %v681_v61 = vmul.f32 %v649_v55, %v1411_v52  ;;  %v585_v52 = vpop.xlane.xlu2 %584 }
 0x10e   : > { %738 = vst [vmem:[#allocation1] ss:$9 sm:$0xff] %v674_v48  ;;  %v588_v39 = vmax.f32 %v581_v38, 1e-24  ;;  %v590_v3 = vmax.f32 %v585_v52, 1e-24 }
 0x10f   : > { %740 = vst [vmem:[#allocation1 + $0x1] ss:$9 sm:$0xff] %v675_v53 }
 0x110   : > { %742 = vst [vmem:[#allocation1 + $0x2] ss:$9 sm:$0xff] %v676_v54  ;;  %996 = vrsqrt.f32 %v588_v39  ;;  %vm598_vm7 = vweird.f32 %v588_v39  ;;  %vm618_vm14 = vweird.f32 %v590_v3 }
 0x111   : > { %744 = vst [vmem:[#allocation1 + $0x3] ss:$9 sm:$0xff] %v677_v56 }
 0x112   : > { %746 = vst [vmem:[#allocation1 + $0x4] ss:$9 sm:$0xff] %v678_v57 }
 0x113   : > { %748 = vst [vmem:[#allocation1 + $0x5] ss:$9 sm:$0xff] %v679_v59 }
 0x114   : > { %750 = vst [vmem:[#allocation1 + $0x6] ss:$9 sm:$0xff] %v680_v58  ;;  %v583_v40 = vpop.xlane.xlu1 %582 }
 0x115   : > { %752 = vst [vmem:[#allocation1 + $0x7] ss:$9 sm:$0xff] %v681_v61  ;;  %v589_v49 = vmax.f32 %v583_v40, 1e-24  ;;  %v587_v9 = vpop.xlane.xlu2 %586 }
 0x116   : > { %v997_v50 = vpop.eup %996  ;;  %v591_v10 = vmax.f32 %v587_v9, 1e-24 }
 0x117   : > { %998 = vrsqrt.f32 %v589_v49  ;;  %v593_v51 = vmul.f32 %v997_v50, %v588_v39  ;;  %vm599_vm8 = vweird.f32 %v997_v50  ;;  %vm608_vm10 = vweird.f32 %v589_v49 }
 0x118   : > { %1000 = vrsqrt.f32 %v590_v3  ;;  %vm600_vm9 = vmor %vm598_vm7, %vm599_vm8  ;;  %vm628_vm1 = vweird.f32 %v591_v10 }
 0x119   : > { %v594_v63 = vmul.f32 %v997_v50, %v593_v51  ;;  %1002 = vrsqrt.f32 %v591_v10 }
 0x11b   : > { %v595_v1 = vmul.f32 0.5, %v594_v63 }
 0x11c   : > { %v753_v37 = vld [vmem:[#allocation1] sm:$0xff] }
 0x11d   : > { %770 = vmatpush.xpose.msra.mxu1 %v753_v37  ;;  %936 = vmatpush.xpose.msra.mxu3 %v753_v37  ;;  %v999_v62 = vpop.eup %998 }
 0x11e   : > { %v603_v0 = vmul.f32 %v999_v62, %v589_v49  ;;  %v1001_v13 = vpop.eup %1000  ;;  %vm609_vm11 = vweird.f32 %v999_v62 }
 0x11f   : > { %v613_v16 = vmul.f32 %v1001_v13, %v590_v3  ;;  %vm610_vm12 = vmor %vm608_vm10, %vm609_vm11  ;;  %v1003_v20 = vpop.eup %1002  ;;  %vm619_vm15 = vweird.f32 %v1001_v13 }
 0x120   : > { %771 = vmatmul.f32.vlgmr.msra.gmra.mxu1 %v1427_v60  ;;  %774 = vmatmul.f32.vlgmr.msra.gmra.mxu3 %v1431_v2  ;;  %v604_v8 = vmul.f32 %v999_v62, %v603_v0  ;;  %v596_v60 = vsub.f32 1.5, %v595_v1  ;;  %v623_v28 = vmul.f32 %v1003_v20, %v591_v10  ;;  %vm620_vm0 = vmor %vm618_vm14, %vm619_vm15  ;;  %vm629_vm2 = vweird.f32 %v1003_v20 }
 0x121   : > { %v614_v26 = vmul.f32 %v1001_v13, %v613_v16  ;;  %vm630_vm3 = vmor %vm628_vm1, %vm629_vm2 }
 0x122   : > { %v605_v2 = vmul.f32 0.5, %v604_v8  ;;  %v597_v11 = vmul.f32 %v997_v50, %v596_v60  ;;  %v624_v33 = vmul.f32 %v1003_v20, %v623_v28 }
 0x123   : > { %v615_v30 = vmul.f32 0.5, %v614_v26 }
 0x124   : > { %v606_v12 = vsub.f32 1.5, %v605_v2  ;;  %v601_v14 = vsel %vm600_vm9, %v997_v50, %v597_v11  ;;  %v625_v35 = vmul.f32 0.5, %v624_v33 }
 0x125   : > { %v780_v18 = vmul.f32 %v779_v15, %v601_v14  ;;  %v616_v34 = vsub.f32 1.5, %v615_v30 }
 0x126   : > { %v607_v17 = vmul.f32 %v999_v62, %v606_v12  ;;  %v626_v4 = vsub.f32 1.5, %v625_v35 }
 0x127   : > { %v617_v36 = vmul.f32 %v1001_v13, %v616_v34 }
 0x128   : > { %v611_v27 = vsel %vm610_vm12, %v999_v62, %v607_v17  ;;  %v627_v6 = vmul.f32 %v1003_v20, %v626_v4 }
 0x129   : > { %v781_v29 = vmul.f32 %v779_v15, %v611_v27  ;;  %v621_v5 = vsel %vm620_vm0, %v1001_v13, %v617_v36 }
 0x12a   : > { %v782_v7 = vmul.f32 %v779_v15, %v621_v5  ;;  %v631_v42 = vsel %vm630_vm3, %v1003_v20, %v627_v6 }
 0x12b   : > { %v783_v22 = vmul.f32 %v779_v15, %v631_v42 }
 0x188   : > { %v724_v19 = vpop.f32.mrf.mxu0 }
 0x189   : > { %v784_v25 = vmul.f32 %v780_v18, %v724_v19 }
 0x18b   : > { %789 = vst.msk [vmem:[%s1458_s10] sm:$0xff] %vm788_vm13, %v784_v25 }
 0x18e   : > { %v727_v31 = vpop.f32.mrf.mxu2 }
 0x18f   : > { %v785_v32 = vmul.f32 %v781_v29, %v727_v31 }
 0x191   : > { %790 = vst.msk [vmem:[%s1458_s10 + $0x8] sm:$0xff] %vm788_vm13, %v785_v32 }
 0x19d   : > { %v772_v21 = vpop.f32.mrf.mxu1 }
 0x19e   : > { %v786_v41 = vmul.f32 %v782_v7, %v772_v21 }
 0x1a0   : > { %791 = vst.msk [vmem:[%s1458_s10 + $0x10] sm:$0xff] %vm788_vm13, %v786_v41 }
 0x1a3   : > { %v775_v23 = vpop.f32.mrf.mxu3 }
 0x1a4   : > { %v787_v24 = vmul.f32 %v783_v22, %v775_v23 }
 0x1a6   : > { %792 = vst.msk [vmem:[%s1458_s10 + $0x18] sm:$0xff] %vm788_vm13, %v787_v24 }
 0x1a7 PF: > { %p18_p8 = scmp.ge.s32.totalorder %s1190_s21, 4   ;;  %s1489_s17 = smov %s1124_s18 }
 0x1a8   : > { %s1490_s18 = smov %s1128_s19  ;;  %s1491_s19 = smov %s1200_s24 }
 0x1a9   : > { %s1492_s20 = smov %s1190_s21  ;;  %20 = sbr.rel (!%p18_p8) target bundleno = 7 (0x7), region = 121 }
 0x1ae   :  { %817 = vsyncpa [#allocation4], 1 }
 0x1af   :  { %819 = vsyncpa [#allocation4 + $0x1], 1 }
 0x1b0   :  { %820 = vsyncpa [#allocation6], 1 }
 0x1b1   :  { %822 = vsyncpa [#allocation6 + $0x1], 1 }

</bundles_post_ra>
